<compile_context>
chip_gen: v7x
topology: tpu7x:2x2x1
jax: 0.10.0
libtpu: 0.0.40
codegen_flags: <defaults>
</compile_context>

<pallas_src>
import numpy as np
import jax
import jax.numpy as jnp
from jax import lax
from jax.experimental import pallas as pl
from jax.experimental.pallas import tpu as pltpu

# ----------------------------- problem sizes --------------------------------
B, CIN, H, W = 2, 4, 16, 16       # input (PyTorch x: [B, CIN, H, W])
F1, NC = 8, 3                     # unet hidden channels, unet output classes
F2, NOUT = 8, 10                  # cnn hidden channels, cnn output classes
NPAD = 128                        # lane-dense output width (sliced to NOUT outside)
BH = B * H                        # rows of the activation slab

# ---- weight slab layout (rows; every block start is a multiple of 8) --------
W1_OFF, W2_OFF, WC_OFF, WFC_OFF = 0, 192, 576, 768
WSLAB_ROWS = 896
K1, K2, KC = W * CIN, W * F1, W * CIN      # K per kh-tap for each conv

# ---- aux slab layout (rows; every block start is a multiple of 8) -----------
SP_R, SUP_R, SDN_R, POOL_R = 0, 16, 48, 80
B1_R, B2_R, BC_R, BFC_R = 88, 96, 104, 112
AUX_ROWS = 120


# ------------------------------- the kernel ---------------------------------
def combined_kernel(x_ref,                 # (BH, W*CIN)   activation slab
                    w_ref,                 # (896, 128)    packed conv/fc weights
                    aux_ref,               # (120, 128)    spread/shift/pool/biases
                    out_ref):              # (B, NPAD)
    f32 = jnp.float32
    x = x_ref[...]                                          # (32, 64)

    # shift matrices: up[r] = act[r-1] (0 on per-batch top rows),
    #                 dn[r] = act[r+1] (0 on per-batch bottom rows)
    s_up = aux_ref[SUP_R:SUP_R + BH, 0:BH]                  # (32, 32)
    s_dn = aux_ref[SDN_R:SDN_R + BH, 0:BH]                  # (32, 32)

    def conv3x3(act, off, k, ncols, brow, relu):
        # act: (BH, k). 3x3 SAME conv as split-K accumulation of 3 matmuls
        # against the kh = 0/1/2 blocks of the block-Toeplitz weight slab.
        up = jnp.dot(s_up, act, preferred_element_type=f32)
        dn = jnp.dot(s_dn, act, preferred_element_type=f32)
        acc = jnp.dot(up, w_ref[off:off + k, 0:ncols],
                      preferred_element_type=f32)
        acc += jnp.dot(act, w_ref[off + k:off + 2 * k, 0:ncols],
                       preferred_element_type=f32)
        acc += jnp.dot(dn, w_ref[off + 2 * k:off + 3 * k, 0:ncols],
                       preferred_element_type=f32)
        acc += aux_ref[brow:brow + 1, 0:ncols]
        return jnp.maximum(acc, 0.0) if relu else acc

    # ---- unet: conv3x3+ReLU -> conv3x3 (channel-major logits) ----
    f1 = conv3x3(x, W1_OFF, K1, W * F1, B1_R, relu=True)     # (32, 128)
    lc = conv3x3(f1, W2_OFF, K2, NC * W, B2_R, relu=False)   # (32, 48)

    # ---- channel softmax + max -> attention gate (NC = 3, explicit VPU ops) ----
    l0 = lc[:, 0 * W:1 * W]
    l1 = lc[:, 1 * W:2 * W]
    l2 = lc[:, 2 * W:3 * W]
    m = jnp.maximum(jnp.maximum(l0, l1), l2)
    s = jnp.exp(l0 - m) + jnp.exp(l1 - m) + jnp.exp(l2 - m)  # softmax denom
    r = pl.reciprocal(s, approx=True)
    r = r * (2.0 - s * r)                 # one Newton step -> full f32 accuracy
    gate = r + 1.0                        # attn = max softmax prob = 1/s

    # ---- gated input: spread per-pixel gate across the CIN lanes of each pixel ----
    sp = aux_ref[SP_R:SP_R + W, 0:W * CIN]                   # (16, 64)
    comb = jnp.dot(gate, sp, preferred_element_type=f32) * x  # (32, 64)

    # ---- cnn: conv3x3+ReLU -> GAP (pool matmul) -> FC (W-tiled, 1/(H*W) folded) ----
    fcf = conv3x3(comb, WC_OFF, KC, W * F2, BC_R, relu=True)  # (32, 128)
    pool = aux_ref[POOL_R:POOL_R + B, 0:BH]                   # (2, 32)
    pooled = jnp.dot(pool, fcf, preferred_element_type=f32)   # (2, 128)
    out_ref[...] = (jnp.dot(pooled, w_ref[WFC_OFF:WFC_OFF + W * F2, :],
                            preferred_element_type=f32)
                    + aux_ref[BFC_R:BFC_R + 1, :])


# ----------------------- wrapper-side weight transforms ----------------------
def _band_matrix():
    # band[kw, wo, wu] = 1  iff  wu == wo + kw - 1  and  0 <= wu < W
    m = np.zeros((3, W, W), np.float32)
    for kw in range(3):
        for wo in range(W):
            wu = wo + kw - 1
            if 0 <= wu < W:
                m[kw, wo, wu] = 1.0
    return jnp.asarray(m)


def _conv_weight(w, channels_major=False):
    # w: (3,3,Cin,Cout) -> block-Toeplitz (3*W*Cin, W*Cout) matching the kernel:
    #   K index = kh*(W*Cin) + wu*Cin + ci
    #   N index = wo*Cout + co        (or co*W + wo if channels_major)
    band = _band_matrix()
    big = jnp.einsum('kxio,xwu->kuiwo', w, band)          # (3, W, Cin, W, Cout)
    if channels_major:
        big = big.transpose(0, 1, 2, 4, 3)                # (3, W, Cin, Cout, W)
    cin = w.shape[2]
    return big.reshape(3 * W * cin, -1)


def _weight_slab(w1, w2, wc, wfc):
    # one lane-dense (896, 128) slab: w1 | w2 (cols padded 48->128) | wc | fused fc
    w1t = _conv_weight(w1)                                    # (192, 128)
    w2t = _conv_weight(w2, channels_major=True)               # (384, 48)
    wct = _conv_weight(wc)                                    # (192, 128)
    wfct = jnp.tile(wfc, (W, 1)) * (1.0 / (H * W))            # (128, 10)
    slab = jnp.zeros((WSLAB_ROWS, 128), jnp.float32)
    slab = slab.at[W1_OFF:W1_OFF + 3 * K1, :].set(w1t)
    slab = slab.at[W2_OFF:W2_OFF + 3 * K2, 0:NC * W].set(w2t)
    slab = slab.at[WC_OFF:WC_OFF + 3 * KC, :].set(wct)
    slab = slab.at[WFC_OFF:WFC_OFF + W * F2, 0:NOUT].set(wfct)
    return slab


def _aux_slab(b1, b2, bc, bfc):
    # constants (spread / shift / pool matrices) built in numpy, biases spliced in
    aux = np.zeros((AUX_ROWS, 128), np.float32)
    # gate-spread: sp[wo, wo*CIN + c] = 1  (broadcast per-pixel gate to its CIN lanes)
    for wo in range(W):
        aux[SP_R + wo, wo * CIN:(wo + 1) * CIN] = 1.0
    # row-shift matrices with the per-batch H-boundary zero padding folded in
    for b in range(B):
        for h in range(H):
            r = b * H + h
            if h > 0:
                aux[SUP_R + r, r - 1] = 1.0     # up[r] = act[r-1]
            if h < H - 1:
                aux[SDN_R + r, r + 1] = 1.0     # dn[r] = act[r+1]
    # pooling matrix: pooled[b] = sum_h fcf[b*H + h]
    for b in range(B):
        aux[POOL_R + b, b * H:(b + 1) * H] = 1.0
    aux = jnp.asarray(aux)
    aux = aux.at[B1_R, 0:W * F1].set(jnp.tile(b1, (1, W))[0])       # wo*F1 + f
    aux = aux.at[B2_R, 0:NC * W].set(jnp.repeat(b2, W, axis=1)[0])  # co*W + wo
    aux = aux.at[BC_R, 0:W * F2].set(jnp.tile(bc, (1, W))[0])
    aux = aux.at[BFC_R, 0:NOUT].set(bfc[0])
    return aux


# ------------------------------- wrapper -------------------------------------
def combined_model(x_nchw, params):
    """x_nchw: (B, CIN, H, W) float32 -> (B, NOUT) float32."""
    w1, b1, w2, b2, wc, bc, wfc, bfc = params

    # dense activation slab: row = b*H + h, lane = w*CIN + c
    x_l = jnp.transpose(x_nchw, (0, 2, 3, 1)).reshape(BH, W * CIN)

    w_slab = _weight_slab(w1, w2, wc, wfc)                   # (896, 128)
    aux_slab = _aux_slab(b1, b2, bc, bfc)                    # (120, 128)

    operands = (x_l, w_slab, aux_slab)

    def _full(shape):
        nd = len(shape)
        return pl.BlockSpec(shape, lambda i, _nd=nd: (0,) * _nd)

    grid_spec = pltpu.PrefetchScalarGridSpec(
        num_scalar_prefetch=0,
        grid=(1,),                       # batch folded into the M dimension
        in_specs=[_full(op.shape) for op in operands],
        out_specs=pl.BlockSpec((B, NPAD), lambda i: (0, 0)),
    )

    out = pl.pallas_call(
        combined_kernel,
        out_shape=jax.ShapeDtypeStruct((B, NPAD), jnp.float32),
        grid_spec=grid_spec,
        compiler_params=pltpu.CompilerParams(
            dimension_semantics=("arbitrary",)),
    )(*operands)
    return out[:, :NOUT]


# -------------------------- pure-JAX reference -------------------------------
def _conv_ref(x, w, b):
    y = lax.conv_general_dilated(x, w, (1, 1), "SAME",
                                 dimension_numbers=("NHWC", "HWIO", "NHWC"))
    return y + b.reshape(1, 1, 1, -1)


def combined_model_ref(x_nchw, params):
    w1, b1, w2, b2, wc, bc, wfc, bfc = params
    x = jnp.transpose(x_nchw, (0, 2, 3, 1))
    feat1 = jnp.maximum(_conv_ref(x, w1, b1), 0.0)
    logits = _conv_ref(feat1, w2, b2)
    probs = jax.nn.softmax(logits, axis=-1)
    attn = jnp.max(probs, axis=-1, keepdims=True)
    comb = (attn + 1.0) * x
    featc = jnp.maximum(_conv_ref(comb, wc, bc), 0.0)
    gap = jnp.mean(featc, axis=(1, 2))
    return gap @ wfc + bfc.reshape(1, -1)


# ---------------------------------- main -------------------------------------
if __name__ == "__main__":
    key = jax.random.PRNGKey(0)
    ks = jax.random.split(key, 9)

    x = jax.random.normal(ks[0], (B, CIN, H, W), dtype=jnp.float32)

    params = (
        0.1 * jax.random.normal(ks[1], (3, 3, CIN, F1), dtype=jnp.float32),
        0.1 * jax.random.normal(ks[2], (1, F1), dtype=jnp.float32),
        0.1 * jax.random.normal(ks[3], (3, 3, F1, NC), dtype=jnp.float32),
        0.1 * jax.random.normal(ks[4], (1, NC), dtype=jnp.float32),
        0.1 * jax.random.normal(ks[5], (3, 3, CIN, F2), dtype=jnp.float32),
        0.1 * jax.random.normal(ks[6], (1, F2), dtype=jnp.float32),
        0.1 * jax.random.normal(ks[7], (F2, NOUT), dtype=jnp.float32),
        0.1 * jax.random.normal(ks[8], (1, NOUT), dtype=jnp.float32),
    )

    out = jax.block_until_ready(combined_model(x, params))
    ref = jax.block_until_ready(combined_model_ref(x, params))

    assert out.shape == (B, NOUT)
    assert jnp.allclose(out, ref, atol=1e-4, rtol=1e-4), (out, ref)
    print("KERNEL_OK")
</pallas_src>

<mosaic_0001>
module attributes {stable_mosaic.version = 11 : i64} {
  func.func @combined_kernel(%arg0: i32, %arg1: memref<32x64xf32, #tpu.memory_space<vmem>>, %arg2: memref<896x128xf32, #tpu.memory_space<vmem>>, %arg3: memref<120x128xf32, #tpu.memory_space<vmem>>, %arg4: memref<2x128xf32, #tpu.memory_space<vmem>>) attributes {dimension_semantics = [#tpu.dimension_semantics<arbitrary>], iteration_bounds = array<i64: 1>, scalar_prefetch = 0 : i64, scratch_operands = 0 : i64, tpu.core_type = #tpu.core_type<tc>, window_params = [{pipeline_mode = #tpu.pipeline_mode<synchronous>, transform_indices = @transform_0, window_bounds = array<i64: 32, 64>}, {pipeline_mode = #tpu.pipeline_mode<synchronous>, transform_indices = @transform_1, window_bounds = array<i64: 896, 128>}, {pipeline_mode = #tpu.pipeline_mode<synchronous>, transform_indices = @transform_2, window_bounds = array<i64: 120, 128>}, {pipeline_mode = #tpu.pipeline_mode<synchronous>, transform_indices = @transform_3, window_bounds = array<i64: 2, 128>}]} {
    %c0 = arith.constant 0 : index
    %c0_0 = arith.constant 0 : index
    %0 = vector.load %arg1[%c0, %c0_0] : memref<32x64xf32, #tpu.memory_space<vmem>>, vector<32x64xf32>
    %c16 = arith.constant 16 : index
    %c0_1 = arith.constant 0 : index
    %1 = vector.load %arg3[%c16, %c0_1] : memref<120x128xf32, #tpu.memory_space<vmem>>, vector<32x32xf32>
    %c48 = arith.constant 48 : index
    %c0_2 = arith.constant 0 : index
    %2 = vector.load %arg3[%c48, %c0_2] : memref<120x128xf32, #tpu.memory_space<vmem>>, vector<32x32xf32>
    %cst = arith.constant dense<0.000000e+00> : vector<32x64xf32>
    %3 = tpu.matmul %1, %0, %cst {dimension_numbers = #tpu.dot_dimension_numbers<[1], [0], [0], [1], [0, 0, 1, 1], [], []>} : vector<32x32xf32>, vector<32x64xf32>, vector<32x64xf32> -> vector<32x64xf32>
    %cst_3 = arith.constant dense<0.000000e+00> : vector<32x64xf32>
    %4 = tpu.matmul %2, %0, %cst_3 {dimension_numbers = #tpu.dot_dimension_numbers<[1], [0], [0], [1], [0, 0, 1, 1], [], []>} : vector<32x32xf32>, vector<32x64xf32>, vector<32x64xf32> -> vector<32x64xf32>
    %c0_4 = arith.constant 0 : index
    %c0_5 = arith.constant 0 : index
    %5 = vector.load %arg2[%c0_4, %c0_5] : memref<896x128xf32, #tpu.memory_space<vmem>>, vector<64x128xf32>
    %cst_6 = arith.constant dense<0.000000e+00> : vector<32x128xf32>
    %6 = tpu.matmul %3, %5, %cst_6 {dimension_numbers = #tpu.dot_dimension_numbers<[1], [0], [0], [1], [0, 0, 1, 1], [], []>} : vector<32x64xf32>, vector<64x128xf32>, vector<32x128xf32> -> vector<32x128xf32>
    %c64 = arith.constant 64 : index
    %c0_7 = arith.constant 0 : index
    %7 = vector.load %arg2[%c64, %c0_7] : memref<896x128xf32, #tpu.memory_space<vmem>>, vector<64x128xf32>
    %cst_8 = arith.constant dense<0.000000e+00> : vector<32x128xf32>
    %8 = tpu.matmul %0, %7, %cst_8 {dimension_numbers = #tpu.dot_dimension_numbers<[1], [0], [0], [1], [0, 0, 1, 1], [], []>} : vector<32x64xf32>, vector<64x128xf32>, vector<32x128xf32> -> vector<32x128xf32>
    %9 = arith.addf %6, %8 : vector<32x128xf32>
    %c128 = arith.constant 128 : index
    %c0_9 = arith.constant 0 : index
    %10 = vector.load %arg2[%c128, %c0_9] : memref<896x128xf32, #tpu.memory_space<vmem>>, vector<64x128xf32>
    %cst_10 = arith.constant dense<0.000000e+00> : vector<32x128xf32>
    %11 = tpu.matmul %4, %10, %cst_10 {dimension_numbers = #tpu.dot_dimension_numbers<[1], [0], [0], [1], [0, 0, 1, 1], [], []>} : vector<32x64xf32>, vector<64x128xf32>, vector<32x128xf32> -> vector<32x128xf32>
    %12 = arith.addf %9, %11 : vector<32x128xf32>
    %c88 = arith.constant 88 : index
    %c0_11 = arith.constant 0 : index
    %13 = vector.load %arg3[%c88, %c0_11] : memref<120x128xf32, #tpu.memory_space<vmem>>, vector<1x128xf32>
    %14 = vector.broadcast %13 : vector<1x128xf32> to vector<32x128xf32>
    %15 = arith.addf %12, %14 : vector<32x128xf32>
    %cst_12 = arith.constant 0.000000e+00 : f32
    %16 = vector.broadcast %cst_12 : f32 to vector<32x128xf32>
    %17 = arith.maximumf %15, %16 : vector<32x128xf32>
    %cst_13 = arith.constant dense<0.000000e+00> : vector<32x128xf32>
    %18 = tpu.matmul %1, %17, %cst_13 {dimension_numbers = #tpu.dot_dimension_numbers<[1], [0], [0], [1], [0, 0, 1, 1], [], []>} : vector<32x32xf32>, vector<32x128xf32>, vector<32x128xf32> -> vector<32x128xf32>
    %cst_14 = arith.constant dense<0.000000e+00> : vector<32x128xf32>
    %19 = tpu.matmul %2, %17, %cst_14 {dimension_numbers = #tpu.dot_dimension_numbers<[1], [0], [0], [1], [0, 0, 1, 1], [], []>} : vector<32x32xf32>, vector<32x128xf32>, vector<32x128xf32> -> vector<32x128xf32>
    %c192 = arith.constant 192 : index
    %c0_15 = arith.constant 0 : index
    %20 = vector.load %arg2[%c192, %c0_15] : memref<896x128xf32, #tpu.memory_space<vmem>>, vector<128x48xf32>
    %cst_16 = arith.constant dense<0.000000e+00> : vector<32x48xf32>
    %21 = tpu.matmul %18, %20, %cst_16 {dimension_numbers = #tpu.dot_dimension_numbers<[1], [0], [0], [1], [0, 0, 1, 1], [], []>} : vector<32x128xf32>, vector<128x48xf32>, vector<32x48xf32> -> vector<32x48xf32>
    %c320 = arith.constant 320 : index
    %c0_17 = arith.constant 0 : index
    %22 = vector.load %arg2[%c320, %c0_17] : memref<896x128xf32, #tpu.memory_space<vmem>>, vector<128x48xf32>
    %cst_18 = arith.constant dense<0.000000e+00> : vector<32x48xf32>
    %23 = tpu.matmul %17, %22, %cst_18 {dimension_numbers = #tpu.dot_dimension_numbers<[1], [0], [0], [1], [0, 0, 1, 1], [], []>} : vector<32x128xf32>, vector<128x48xf32>, vector<32x48xf32> -> vector<32x48xf32>
    %24 = arith.addf %21, %23 : vector<32x48xf32>
    %c448 = arith.constant 448 : index
    %c0_19 = arith.constant 0 : index
    %25 = vector.load %arg2[%c448, %c0_19] : memref<896x128xf32, #tpu.memory_space<vmem>>, vector<128x48xf32>
    %cst_20 = arith.constant dense<0.000000e+00> : vector<32x48xf32>
    %26 = tpu.matmul %19, %25, %cst_20 {dimension_numbers = #tpu.dot_dimension_numbers<[1], [0], [0], [1], [0, 0, 1, 1], [], []>} : vector<32x128xf32>, vector<128x48xf32>, vector<32x48xf32> -> vector<32x48xf32>
    %27 = arith.addf %24, %26 : vector<32x48xf32>
    %c96 = arith.constant 96 : index
    %c0_21 = arith.constant 0 : index
    %28 = vector.load %arg3[%c96, %c0_21] : memref<120x128xf32, #tpu.memory_space<vmem>>, vector<1x48xf32>
    %29 = vector.broadcast %28 : vector<1x48xf32> to vector<32x48xf32>
    %30 = arith.addf %27, %29 : vector<32x48xf32>
    %31 = vector.extract_strided_slice %30 {offsets = [0, 0], sizes = [32, 16], strides = [1, 1]} : vector<32x48xf32> to vector<32x16xf32>
    %32 = vector.extract_strided_slice %30 {offsets = [0, 16], sizes = [32, 16], strides = [1, 1]} : vector<32x48xf32> to vector<32x16xf32>
    %33 = vector.extract_strided_slice %30 {offsets = [0, 32], sizes = [32, 16], strides = [1, 1]} : vector<32x48xf32> to vector<32x16xf32>
    %34 = arith.maximumf %31, %32 : vector<32x16xf32>
    %35 = arith.maximumf %34, %33 : vector<32x16xf32>
    %36 = arith.subf %31, %35 : vector<32x16xf32>
    %37 = math.exp %36 : vector<32x16xf32>
    %38 = arith.subf %32, %35 : vector<32x16xf32>
    %39 = math.exp %38 : vector<32x16xf32>
    %40 = arith.addf %37, %39 : vector<32x16xf32>
    %41 = arith.subf %33, %35 : vector<32x16xf32>
    %42 = math.exp %41 : vector<32x16xf32>
    %43 = arith.addf %40, %42 : vector<32x16xf32>
    %44 = tpu.reciprocal %43 {approx = true} : vector<32x16xf32> -> vector<32x16xf32>
    %45 = arith.mulf %43, %44 : vector<32x16xf32>
    %cst_22 = arith.constant 2.000000e+00 : f32
    %46 = vector.broadcast %cst_22 : f32 to vector<32x16xf32>
    %47 = arith.subf %46, %45 : vector<32x16xf32>
    %48 = arith.mulf %44, %47 : vector<32x16xf32>
    %cst_23 = arith.constant 1.000000e+00 : f32
    %49 = vector.broadcast %cst_23 : f32 to vector<32x16xf32>
    %50 = arith.addf %48, %49 : vector<32x16xf32>
    %c0_24 = arith.constant 0 : index
    %c0_25 = arith.constant 0 : index
    %51 = vector.load %arg3[%c0_24, %c0_25] : memref<120x128xf32, #tpu.memory_space<vmem>>, vector<16x64xf32>
    %cst_26 = arith.constant dense<0.000000e+00> : vector<32x64xf32>
    %52 = tpu.matmul %50, %51, %cst_26 {dimension_numbers = #tpu.dot_dimension_numbers<[1], [0], [0], [1], [0, 0, 1, 1], [], []>} : vector<32x16xf32>, vector<16x64xf32>, vector<32x64xf32> -> vector<32x64xf32>
    %53 = arith.mulf %52, %0 : vector<32x64xf32>
    %cst_27 = arith.constant dense<0.000000e+00> : vector<32x64xf32>
    %54 = tpu.matmul %1, %53, %cst_27 {dimension_numbers = #tpu.dot_dimension_numbers<[1], [0], [0], [1], [0, 0, 1, 1], [], []>} : vector<32x32xf32>, vector<32x64xf32>, vector<32x64xf32> -> vector<32x64xf32>
    %cst_28 = arith.constant dense<0.000000e+00> : vector<32x64xf32>
    %55 = tpu.matmul %2, %53, %cst_28 {dimension_numbers = #tpu.dot_dimension_numbers<[1], [0], [0], [1], [0, 0, 1, 1], [], []>} : vector<32x32xf32>, vector<32x64xf32>, vector<32x64xf32> -> vector<32x64xf32>
    %c576 = arith.constant 576 : index
    %c0_29 = arith.constant 0 : index
    %56 = vector.load %arg2[%c576, %c0_29] : memref<896x128xf32, #tpu.memory_space<vmem>>, vector<64x128xf32>
    %cst_30 = arith.constant dense<0.000000e+00> : vector<32x128xf32>
    %57 = tpu.matmul %54, %56, %cst_30 {dimension_numbers = #tpu.dot_dimension_numbers<[1], [0], [0], [1], [0, 0, 1, 1], [], []>} : vector<32x64xf32>, vector<64x128xf32>, vector<32x128xf32> -> vector<32x128xf32>
    %c640 = arith.constant 640 : index
    %c0_31 = arith.constant 0 : index
    %58 = vector.load %arg2[%c640, %c0_31] : memref<896x128xf32, #tpu.memory_space<vmem>>, vector<64x128xf32>
    %cst_32 = arith.constant dense<0.000000e+00> : vector<32x128xf32>
    %59 = tpu.matmul %53, %58, %cst_32 {dimension_numbers = #tpu.dot_dimension_numbers<[1], [0], [0], [1], [0, 0, 1, 1], [], []>} : vector<32x64xf32>, vector<64x128xf32>, vector<32x128xf32> -> vector<32x128xf32>
    %60 = arith.addf %57, %59 : vector<32x128xf32>
    %c704 = arith.constant 704 : index
    %c0_33 = arith.constant 0 : index
    %61 = vector.load %arg2[%c704, %c0_33] : memref<896x128xf32, #tpu.memory_space<vmem>>, vector<64x128xf32>
    %cst_34 = arith.constant dense<0.000000e+00> : vector<32x128xf32>
    %62 = tpu.matmul %55, %61, %cst_34 {dimension_numbers = #tpu.dot_dimension_numbers<[1], [0], [0], [1], [0, 0, 1, 1], [], []>} : vector<32x64xf32>, vector<64x128xf32>, vector<32x128xf32> -> vector<32x128xf32>
    %63 = arith.addf %60, %62 : vector<32x128xf32>
    %c104 = arith.constant 104 : index
    %c0_35 = arith.constant 0 : index
    %64 = vector.load %arg3[%c104, %c0_35] : memref<120x128xf32, #tpu.memory_space<vmem>>, vector<1x128xf32>
    %65 = vector.broadcast %64 : vector<1x128xf32> to vector<32x128xf32>
    %66 = arith.addf %63, %65 : vector<32x128xf32>
    %cst_36 = arith.constant 0.000000e+00 : f32
    %67 = vector.broadcast %cst_36 : f32 to vector<32x128xf32>
    %68 = arith.maximumf %66, %67 : vector<32x128xf32>
    %c80 = arith.constant 80 : index
    %c0_37 = arith.constant 0 : index
    %69 = vector.load %arg3[%c80, %c0_37] : memref<120x128xf32, #tpu.memory_space<vmem>>, vector<2x32xf32>
    %cst_38 = arith.constant dense<0.000000e+00> : vector<2x128xf32>
    %70 = tpu.matmul %69, %68, %cst_38 {dimension_numbers = #tpu.dot_dimension_numbers<[1], [0], [0], [1], [0, 0, 1, 1], [], []>} : vector<2x32xf32>, vector<32x128xf32>, vector<2x128xf32> -> vector<2x128xf32>
    %c768 = arith.constant 768 : index
    %c0_39 = arith.constant 0 : index
    %71 = vector.load %arg2[%c768, %c0_39] : memref<896x128xf32, #tpu.memory_space<vmem>>, vector<128x128xf32>
    %cst_40 = arith.constant dense<0.000000e+00> : vector<2x128xf32>
    %72 = tpu.matmul %70, %71, %cst_40 {dimension_numbers = #tpu.dot_dimension_numbers<[1], [0], [0], [1], [0, 0, 1, 1], [], []>} : vector<2x128xf32>, vector<128x128xf32>, vector<2x128xf32> -> vector<2x128xf32>
    %c112 = arith.constant 112 : index
    %c0_41 = arith.constant 0 : index
    %73 = vector.load %arg3[%c112, %c0_41] : memref<120x128xf32, #tpu.memory_space<vmem>>, vector<1x128xf32>
    %74 = vector.broadcast %73 : vector<1x128xf32> to vector<2x128xf32>
    %75 = arith.addf %72, %74 : vector<2x128xf32>
    %c0_42 = arith.constant 0 : index
    %c0_43 = arith.constant 0 : index
    %76 = vector.load %arg4[%c0_42, %c0_43] : memref<2x128xf32, #tpu.memory_space<vmem>>, vector<2x128xf32>
    tpu.vector_store %arg4[%c0_42, %c0_43], %75 {strides = array<i32>} : memref<2x128xf32, #tpu.memory_space<vmem>>, vector<2x128xf32>,
    return
  }
  func.func @transform_0(%arg0: i32) -> (i32, i32) {
    %c0_i32 = arith.constant 0 : i32
    %c0_i32_0 = arith.constant 0 : i32
    %c0_i32_1 = arith.constant 0 : i32
    return %c0_i32, %c0_i32_0 : i32, i32
  }
  func.func @transform_1(%arg0: i32) -> (i32, i32) {
    %c0_i32 = arith.constant 0 : i32
    %c0_i32_0 = arith.constant 0 : i32
    %c0_i32_1 = arith.constant 0 : i32
    return %c0_i32, %c0_i32_0 : i32, i32
  }
  func.func @transform_2(%arg0: i32) -> (i32, i32) {
    %c0_i32 = arith.constant 0 : i32
    %c0_i32_0 = arith.constant 0 : i32
    %c0_i32_1 = arith.constant 0 : i32
    return %c0_i32, %c0_i32_0 : i32, i32
  }
  func.func @transform_3(%arg0: i32) -> (i32, i32) {
    %c0_i32 = arith.constant 0 : i32
    %c0_i32_0 = arith.constant 0 : i32
    %c0_i32_1 = arith.constant 0 : i32
    return %c0_i32, %c0_i32_0 : i32, i32
  }
}

</mosaic_0001>

<bundles_post_ra>
// kernel: tpu_custom_call.1
= control target key start
LH: loop header
LB: loop body
LE: loop exit
PB: predicated region body
PF: predicated region fallthrough
CT: control target
= control target key end

     0   :  { %8 = vsyncpa [#allocation3], 0  ;;  %s3413_s0 = inlined_call_operand.hbm [shape: f32[32,64], index: 0, kind: input, shape index: {}]   ;;  %s3414_s1 = inlined_call_operand.hbm [shape: f32[896,128], index: 1, kind: input, shape index: {}]   ;;  %s3415_s2 = inlined_call_operand.hbm [shape: f32[120,128], index: 2, kind: input, shape index: {}]   ;;  %s3416_s3 = inlined_call_operand.hbm [shape: f32[2,128], index: 3, kind: output, shape index: {}]  }
   0x1   :  { %9 = vsyncpa [#allocation6], 0 }
   0x2   :  { %10 = vsyncpa [#allocation4], 0  ;;  %s3118_s12 = smov [#allocation5]   ;;  %s3119_s14 = smov [#allocation2]  }
   0x3   :  { %s28_s13 = sshll.u32 %s3118_s12, 4  ;;  %s16_s15 = sshll.u32 %s3119_s14, 4  ;;  %s29_s13 = int_to_ptr.vmem [resolvable:$true] %s28_s13  ;;  %s3151_s15 = int_to_ptr.vmem [resolvable:$true] %s16_s15 }
   0x4   :  { %s3024_s18 = scalar_lea.hbm %s3414_s1, 14336 }
   0x5   :  { %p3025_p0 = scmp.ne.s32.totalorder %s3414_s1, %s3024_s18  ;;  %p3028_p1 = scmp.lt.u32.totalorder %s3024_s18, %s3414_s1 }
   0x7   :  { %p3030_p2 = pnand %p3028_p1, %p3025_p0 }
   0x9   :  { %3033 = shalt.err (!%p3030_p2)
}
   0xa   :  { %s3034_s23 = scalar_lea.vmem %s29_s13, 14336  ;;  %p3039_p4 = scmp.lt.s32.totalorder %s29_s13, %s29_s13 }
   0xb   :  { %p3035_p3 = scmp.ne.s32.totalorder %s29_s13, %s3034_s23  ;;  %p3040_p5 = scmp.lt.s32.totalorder %s3034_s23, %s3034_s23 }
   0xd   :  { %p3041_p6 = por %p3040_p5, %p3039_p4 }
   0xf   :  { %p3042_p7 = pnand %p3041_p6, %p3035_p3 }
  0x11   :  { %3045 = shalt.err (!%p3042_p7)
}
  0x12   :  { %s3120_s24 = smov 128   ;;  %s3121_s25 = smov 8  }
  0x13   :  { %34 = dma.hbm_to_vmem [thread:$0]  %s3414_s1, 14336, %s29_s13, [#allocation6], %s3120_s24, %s3120_s24, %s3121_s25  }
  0x14   :  { %s3046_s30 = scalar_lea.hbm %s3413_s0, 512 }
  0x15   :  { %p3047_p8 = scmp.ne.s32.totalorder %s3413_s0, %s3046_s30  ;;  %p3050_p9 = scmp.lt.u32.totalorder %s3046_s30, %s3413_s0 }
  0x17   :  { %p3052_p10 = pnand %p3050_p9, %p3047_p8 }
  0x19   :  { %3055 = shalt.err (!%p3052_p10)
}
  0x1a   :  { %s3056_s8 = scalar_lea.vmem %s3151_s15, 512  ;;  %p3061_p12 = scmp.lt.s32.totalorder %s3151_s15, %s3151_s15 }
  0x1b   :  { %p3057_p11 = scmp.ne.s32.totalorder %s3151_s15, %s3056_s8  ;;  %p3062_p13 = scmp.lt.s32.totalorder %s3056_s8, %s3056_s8 }
  0x1d   :  { %p3063_p0 = por %p3062_p13, %p3061_p12 }
  0x1f   :  { %p3064_p1 = pnand %p3063_p0, %p3057_p11 }
  0x21   :  { %3067 = shalt.err (!%p3064_p1)
}
  0x22   :  { %22 = dma.hbm_to_vmem [thread:$0]  %s3413_s0, 512, %s3151_s15, [#allocation3], %s3120_s24, %s3120_s24, %s3121_s25  }
  0x23   :  { %s3122_s10 = smov [#allocation7]   ;;  %s3068_s14 = scalar_lea.hbm %s3415_s2, 1920 }
  0x24   :  { %s40_s11 = sshll.u32 %s3122_s10, 4  ;;  %p3069_p2 = scmp.ne.s32.totalorder %s3415_s2, %s3068_s14  ;;  %s41_s11 = int_to_ptr.vmem [resolvable:$true] %s40_s11 }
  0x25   :  { %p3072_p3 = scmp.lt.u32.totalorder %s3068_s14, %s3415_s2 }
  0x27   :  { %p3074_p4 = pnand %p3072_p3, %p3069_p2 }
  0x29   :  { %3077 = shalt.err (!%p3074_p4)
}
  0x2a   :  { %s3078_s20 = scalar_lea.vmem %s41_s11, 1920  ;;  %p3083_p6 = scmp.lt.s32.totalorder %s41_s11, %s41_s11 }
  0x2b   :  { %p3079_p5 = scmp.ne.s32.totalorder %s41_s11, %s3078_s20  ;;  %p3084_p7 = scmp.lt.s32.totalorder %s3078_s20, %s3078_s20 }
  0x2d   :  { %p3085_p8 = por %p3084_p7, %p3083_p6 }
  0x2f   :  { %p3086_p9 = pnand %p3085_p8, %p3079_p5 }
  0x31   :  { %3089 = shalt.err (!%p3086_p9)
}
  0x32   :  { %46 = dma.hbm_to_vmem [thread:$0]  %s3415_s2, 1920, %s41_s11, [#allocation6], %s3120_s24, %s3120_s24, %s3121_s25  }
  0x33   :  { %3112 = dma.done.wait [#allocation3], 512  }
  0x34   :  { %3113 = vsyncadd [#allocation3], 4294966784 }
  0x35   :  { %3114 = dma.done.wait [#allocation6], 16256  }
  0x36   :  { %3115 = vsyncadd [#allocation6], 4294951040  ;;  %vm68_vm0 = vcmask 261120   ;;  %v3203_v0 = vld [vmem:[#allocation2] sm:$0xff]  ;;  %v3205_v1 = vld [vmem:[#allocation2 + $0x8] sm:$0xff]  ;;  %vm279_vm1 = vcmask 523264  }
  0x37   :  { %v3207_v2 = vld [vmem:[#allocation2 + $0x10] sm:$0xff]  ;;  %v2681_v3 = vpack.c.bf16 %v3205_v1, %v3203_v0  ;;  %v3211_v4 = vld [vmem:[#allocation2 + $0x18] sm:$0xff]  ;;  %v263_v8 = vld [vmem:[#allocation5] sm:$0xff]  ;;  %s3123_s2 = smov 96   ;;  %s3124_s21 = smov 112   ;;  %vm1244_vm2 = vcmask 130048  }
  0x38   :  { %v3213_v5 = vld [vmem:[#allocation7 + $0x10] sm:$0xff]  ;;  %v2685_v6 = vpack.c.bf16 %v3211_v4, %v3207_v2  ;;  %v264_v9 = vld [vmem:[#allocation5 + $0x8] sm:$0xff]  ;;  %v266_v12 = vld [vmem:[#allocation5 + $0x18] sm:$0xff]  ;;  %s3125_s22 = smov 16   ;;  %s3126_s23 = smov 32   ;;  %vm3128_vm3 = vmmov 0  }
  0x39   :  { %2303 = vmatprep.mubr.msk.f32.mxu0 %vm68_vm0, %v3213_v5  ;;  %2682 = vmatprep.subr.bf16.mxu0 %v2681_v3  ;;  %v3219_v7 = vld [vmem:[#allocation7 + $0x30] sm:$0xff]  ;;  %v2713_v10 = vpack.c.bf16 %v264_v9, %v263_v8  ;;  %v3223_v13 = vld [vmem:[#allocation7 + $0x18] sm:$0xff]  ;;  %v3227_v15 = vld [vmem:[#allocation7 + $0x20] sm:$0xff]  ;;  %s3130_s24 = smov [#allocation8]  }
  0x3a   :  { %2690 = vmatprep.subr.bf16.mxu1 %v2681_v3  ;;  %2684 = vmatpush3.bf16.msra.mxu0 %v2681_v3  ;;  %v265_v11 = vld [vmem:[#allocation5 + $0x10] sm:$0xff]  ;;  %v3225_v14 = vld [vmem:[#allocation7 + $0x38] sm:$0xff]  ;;  %v3229_v16 = vld [vmem:[#allocation7 + $0x40] sm:$0xff]  ;;  %s2020_s25 = sshll.u32 %s3130_s24, 4  ;;  %s2021_s25 = int_to_ptr.vmem [resolvable:$true] %s2020_s25 }
  0x3b   :  { %2692 = vmatpush3.bf16.msra.mxu1 %v2681_v3  ;;  %2686 = vmatprep.subr.bf16.mxu0 %v2685_v6  ;;  %v2717_v17 = vpack.c.bf16 %v266_v12, %v265_v11  ;;  %v267_v18 = vld [vmem:[#allocation5 + $0x20] sm:$0xff]  ;;  %v268_v19 = vld [vmem:[#allocation5 + $0x28] sm:$0xff]  ;;  %v269_v23 = vld [vmem:[#allocation5 + $0x30] sm:$0xff]  ;;  %s3090_s26 = scalar_lea.vmem %s2021_s25, 32  ;;  %p3095_p11 = scmp.lt.s32.totalorder %s2021_s25, %s2021_s25 }
  0x3c   :  { %2694 = vmatprep.subr.bf16.mxu1 %v2685_v6  ;;  %2317 = vmatprep.mubr.msk.f32.mxu1 %vm68_vm0, %v3219_v7  ;;  %v3237_v20 = vld [vmem:[#allocation7 + $0x28] sm:$0xff]  ;;  %v2721_v22 = vpack.c.bf16 %v268_v19, %v267_v18  ;;  %v270_v24 = vld [vmem:[#allocation5 + $0x38] sm:$0xff]  ;;  %v271_v26 = vld [vmem:[#allocation5 + $0x40] sm:$0xff]  ;;  %p3091_p10 = scmp.ne.s32.totalorder %s2021_s25, %s3090_s26  ;;  %p3096_p12 = scmp.lt.s32.totalorder %s3090_s26, %s3090_s26 }
  0x3d   :  { %v3241_v21 = vld [vmem:[#allocation7 + $0x48] sm:$0xff]  ;;  %v2725_v25 = vpack.c.bf16 %v270_v24, %v269_v23  ;;  %v474_v29 = vld [vmem:[#allocation5 + $0x80] sm:$0xff]  ;;  %v273_v32 = vld [vmem:[#allocation5 + $0x50] sm:$0xff] }
  0x3e   :  { %2688 = vmatpush3.bf16.msra.mxu0 %v2685_v6  ;;  %v272_v27 = vld [vmem:[#allocation5 + $0x48] sm:$0xff]  ;;  %v274_v33 = vld [vmem:[#allocation5 + $0x58] sm:$0xff]  ;;  %v275_v35 = vld [vmem:[#allocation5 + $0x60] sm:$0xff]  ;;  %p3097_p13 = por %p3096_p12, %p3095_p11 }
  0x3f   :  { %2696 = vmatpush3.bf16.msra.mxu1 %v2685_v6  ;;  %2714 = vmatprep.subr.bf16.mxu0 %v2713_v10  ;;  %v2697_v28 = vpack.c.bf16 %v272_v27, %v271_v26  ;;  %v475_v30 = vld [vmem:[#allocation5 + $0x88] sm:$0xff]  ;;  %v2701_v34 = vpack.c.bf16 %v274_v33, %v273_v32  ;;  %v277_v38 = vld [vmem:[#allocation5 + $0x70] sm:$0xff]  ;;  %v278_v39 = vld [vmem:[#allocation5 + $0x78] sm:$0xff] }
  0x40   :  { %v2729_v31 = vpack.c.bf16 %v475_v30, %v474_v29  ;;  %v276_v36 = vld [vmem:[#allocation5 + $0x68] sm:$0xff]  ;;  %v2709_v40 = vpack.c.bf16 %v278_v39, %v277_v38  ;;  %v476_v41 = vld [vmem:[#allocation5 + $0x90] sm:$0xff]  ;;  %v477_v42 = vld [vmem:[#allocation5 + $0x98] sm:$0xff]  ;;  %p3098_p0 = pnand %p3097_p13, %p3091_p10 }
  0x41   :  { %2304 = vmatmul.mubr.msk.f32.vlgmr.msra.gmra.mrb[0].mxu0 %vm68_vm0, %v3223_v13  ;;  %2698 = vmatprep.subr.bf16.mxu1 %v2697_v28  ;;  %v2705_v37 = vpack.c.bf16 %v276_v36, %v275_v35  ;;  %v2733_v46 = vpack.c.bf16 %v477_v42, %v476_v41  ;;  %v478_v48 = vld [vmem:[#allocation5 + $0xa0] sm:$0xff]  ;;  %v479_v49 = vld [vmem:[#allocation5 + $0xa8] sm:$0xff]  ;;  %v480_v55 = vld [vmem:[#allocation5 + $0xb0] sm:$0xff] }
  0x42   :  { %2318 = vmatmul.mubr.msk.f32.vlgmr.msra.gmra.mrb[0].mxu1 %vm68_vm0, %v3225_v14  ;;  %2306 = vmatprep.mubr.msk.f32.mxu0 %vm68_vm0, %v3227_v15  ;;  %v2737_v53 = vpack.c.bf16 %v479_v49, %v478_v48  ;;  %v481_v56 = vld [vmem:[#allocation5 + $0xb8] sm:$0xff]  ;;  %v782_v29 = vld [vmem:[#allocation5 + $0x140] sm:$0xff]  ;;  %v783_v30 = vld [vmem:[#allocation5 + $0x148] sm:$0xff] }
  0x43   :  { %2320 = vmatprep.mubr.msk.f32.mxu1 %vm68_vm0, %v3229_v16  ;;  %2716 = vmatpush3.bf16.msra.mxu0 %v2713_v10  ;;  %v2741_v57 = vpack.c.bf16 %v481_v56, %v480_v55  ;;  %v2050_v63 = vld [vmem:[#allocation7 + $0x58] ss:$0 sm:$0xff]  ;;  %v784_v32 = vld [vmem:[#allocation5 + $0x150] sm:$0xff]  ;;  %v786_v35 = vld [vmem:[#allocation5 + $0x160] sm:$0xff] }
  0x44   :  { %2718 = vmatprep.subr.bf16.mxu0 %v2717_v17  ;;  %2700 = vmatpush3.bf16.msra.mxu1 %v2697_v28  ;;  %v785_v33 = vld [vmem:[#allocation5 + $0x158] sm:$0xff]  ;;  %v787_v36 = vld [vmem:[#allocation5 + $0x168] sm:$0xff]  ;;  %v788_v38 = vld [vmem:[#allocation5 + $0x170] sm:$0xff] }
  0x45   :  { %2307 = vmatmul.mubr.msk.f32.gmra.mrb[2].mxu0 %vm68_vm0, %v3237_v20  ;;  %2702 = vmatprep.subr.bf16.mxu1 %v2701_v34  ;;  %v789_v39 = vld [vmem:[#allocation5 + $0x178] sm:$0xff]  ;;  %v790_v41 = vld [vmem:[#allocation5 + $0x180] sm:$0xff]  ;;  %v791_v42 = vld [vmem:[#allocation5 + $0x188] sm:$0xff] }
  0x46   :  { %2321 = vmatmul.mubr.msk.f32.gmra.mrb[2].mxu1 %vm68_vm0, %v3241_v21  ;;  %v795_v48 = vld [vmem:[#allocation5 + $0x1a8] sm:$0xff]  ;;  %v768_v56 = vld [vmem:[#allocation5 + $0xd0] sm:$0xff] }
  0x47   :  { %2720 = vmatpush3.bf16.msra.mxu0 %v2717_v17  ;;  %2339 = vmatprep.mubr.msk.f32.mxu1 %vm279_vm1, %v3203_v0 }
  0x48   :  { %2722 = vmatprep.subr.bf16.mxu0 %v2721_v22  ;;  %2704 = vmatpush3.bf16.msra.mxu1 %v2701_v34  ;;  %v2765_v34 = vpack.c.bf16 %v785_v33, %v784_v32  ;;  %v972_v33 = vld [vmem:[#allocation5 + $0x1e0] sm:$0xff] }
  0x49   :  { %2706 = vmatprep.subr.bf16.mxu1 %v2705_v37 }
  0x4b   :  { %2724 = vmatpush3.bf16.msra.mxu0 %v2721_v22 }
  0x4c   :  { %2726 = vmatprep.subr.bf16.mxu0 %v2725_v25  ;;  %2708 = vmatpush3.bf16.msra.mxu1 %v2705_v37  ;;  %v2769_v37 = vpack.c.bf16 %v787_v36, %v786_v35 }
  0x4d   :  { %2710 = vmatprep.subr.bf16.mxu1 %v2709_v40 }
  0x4f   :  { %2728 = vmatpush3.bf16.msra.mxu0 %v2725_v25 }
  0x50   :  { %2730 = vmatprep.subr.bf16.mxu0 %v2729_v31  ;;  %2712 = vmatpush3.bf16.msra.mxu1 %v2709_v40  ;;  %v2773_v40 = vpack.c.bf16 %v789_v39, %v788_v38  ;;  %v974_v38 = vld [vmem:[#allocation5 + $0x1f0] sm:$0xff]  ;;  %v975_v39 = vld [vmem:[#allocation5 + $0x1f8] sm:$0xff] }
  0x53   :  { %2340 = vmatmul.mubr.msk.f32.vlgmr.msra.gmra.mrb[4].mxu1 %vm279_vm1, %v3205_v1 }
  0x54   :  { %2342 = vmatprep.mubr.msk.f32.mxu1 %vm279_vm1, %v3207_v2 }
  0x57   :  { %2343 = vmatmul.mubr.msk.f32.gmra.mrb[6].mxu1 %vm279_vm1, %v3211_v4 }
  0x58   :  { %2397 = vmatprep.mubr.msk.f32.mxu1 %vm68_vm0, %v3213_v5 }
 0x114   :  { %v2305_v43 = vpop.f32.mrb[0].mxu0 }
 0x115   :  { %v2319_v44 = vpop.f32.mrb[0].mxu1  ;;  %v147_v45 = vpop.f32.mrb[1].mxu0 }
 0x116   :  { %v244_v47 = vpop.f32.mrb[1].mxu1  ;;  %2361 = vmatprep.mubr.msk.f32.mxu0 %vm279_vm1, %v147_v45  ;;  %v793_v45 = vld [vmem:[#allocation5 + $0x198] sm:$0xff] }
 0x117   :  { %2362 = vmatmul.mubr.msk.f32.vlgmr.msra.gmra.mrb[4].mxu0 %vm279_vm1, %v2305_v43  ;;  %v2777_v43 = vpack.c.bf16 %v791_v42, %v790_v41  ;;  %v2837_v41 = vpack.c.bf16 %v975_v39, %v974_v38 }
 0x118   :  { %2732 = vmatpush3.bf16.msra.mxu0 %v2729_v31  ;;  %v2308_v50 = vpop.f32.mrb[2].mxu0  ;;  %v2761_v31 = vpack.c.bf16 %v783_v30, %v782_v29  ;;  %v971_v29 = vld [vmem:[#allocation5 + $0x1d8] sm:$0xff] }
 0x119   :  { %v2322_v51 = vpop.f32.mrb[2].mxu1  ;;  %2734 = vmatprep.subr.bf16.mxu0 %v2733_v46  ;;  %v157_v52 = vpop.f32.mrb[3].mxu0 }
 0x11a   :  { %v254_v54 = vpop.f32.mrb[3].mxu1  ;;  %2364 = vmatprep.mubr.msk.f32.mxu0 %vm279_vm1, %v157_v52 }
 0x11b   :  { %2365 = vmatmul.mubr.msk.f32.gmra.mrb[6].mxu0 %vm279_vm1, %v2308_v50  ;;  %v796_v50 = vld [vmem:[#allocation5 + $0x1b0] sm:$0xff] }
 0x11c   :  { %2736 = vmatpush3.bf16.msra.mxu0 %v2733_v46  ;;  %2383 = vmatprep.mubr.msk.f32.mxu0 %vm279_vm1, %v244_v47  ;;  %v794_v47 = vld [vmem:[#allocation5 + $0x1a0] sm:$0xff] }
 0x11d   :  { %2738 = vmatprep.subr.bf16.mxu0 %v2737_v53  ;;  %v2785_v49 = vpack.c.bf16 %v795_v48, %v794_v47  ;;  %v978_v48 = vld [vmem:[#allocation5 + $0x210] sm:$0xff] }
 0x120   :  { %2740 = vmatpush3.bf16.msra.mxu0 %v2737_v53  ;;  %v766_v53 = vld [vmem:[#allocation5 + $0xc0] sm:$0xff] }
 0x121   :  { %2742 = vmatprep.subr.bf16.mxu0 %v2741_v57 }
 0x124   :  { %2744 = vmatpush3.bf16.msra.mxu0 %v2741_v57  ;;  %v769_v57 = vld [vmem:[#allocation5 + $0xd8] sm:$0xff] }
 0x126   :  { %v2341_v58 = vpop.f32.mrb[4].mxu1 }
 0x127   :  { %2384 = vmatmul.mubr.msk.f32.vlgmr.msra.gmra.mrb[4].mxu0 %vm279_vm1, %v2319_v44  ;;  %v358_v59 = vpop.f32.mrb[5].mxu1  ;;  %v792_v44 = vld [vmem:[#allocation5 + $0x190] sm:$0xff] }
 0x128   :  { %2386 = vmatprep.mubr.msk.f32.mxu0 %vm279_vm1, %v254_v54  ;;  %v2781_v46 = vpack.c.bf16 %v793_v45, %v792_v44  ;;  %v767_v54 = vld [vmem:[#allocation5 + $0xc8] sm:$0xff] }
 0x129   :  { %v2793_v55 = vpack.c.bf16 %v767_v54, %v766_v53  ;;  %v977_v44 = vld [vmem:[#allocation5 + $0x208] sm:$0xff]  ;;  %v982_v54 = vld [vmem:[#allocation5 + $0x230] sm:$0xff] }
 0x12a   :  { %v2344_v60 = vpop.f32.mrb[6].mxu1 }
 0x12b   :  { %2387 = vmatmul.mubr.msk.f32.gmra.mrb[6].mxu0 %vm279_vm1, %v2322_v51  ;;  %v368_v61 = vpop.f32.mrb[7].mxu1  ;;  %v797_v51 = vld [vmem:[#allocation5 + $0x1b8] sm:$0xff] }
 0x12c   :  { %v2789_v52 = vpack.c.bf16 %v797_v51, %v796_v50  ;;  %v980_v51 = vld [vmem:[#allocation5 + $0x220] sm:$0xff] }
 0x1fa   :  { %v2385_v62 = vpop.f32.mrb[4].mxu0 }
 0x1fb   :  { %v2955_v3 = vadd.f32 %v2385_v62, %v2341_v58  ;;  %v560_v6 = vpop.f32.mrb[5].mxu0  ;;  %v2797_v58 = vpack.c.bf16 %v769_v57, %v768_v56  ;;  %v772_v62 = vld [vmem:[#allocation5 + $0xf0] sm:$0xff]  ;;  %v2059_v57 = vld [vmem:[#allocation7 + $0x60] ss:$0 sm:$0xff] }
 0x1fc   :  { %v2956_v8 = vadd.f32 %v560_v6, %v358_v59  ;;  %v770_v59 = vld [vmem:[#allocation5 + $0xe0] sm:$0xff] }
 0x1fd   :  { %v3265_v9 = vadd.f32 %v2955_v3, %v2050_v63  ;;  %v774_v6 = vld [vmem:[#allocation5 + $0x100] sm:$0xff] }
 0x1fe   :  { %v588_v10 = vadd.f32 %v2956_v8, %v2050_v63  ;;  %v2388_v11 = vpop.f32.mrb[6].mxu0  ;;  %v775_v8 = vld [vmem:[#allocation5 + $0x108] sm:$0xff] }
 0x1ff   :  { %v593_v12 = vmax.f32 %v3265_v9, 0.0  ;;  %v2957_v17 = vadd.f32 %v2388_v11, %v2344_v60  ;;  %v570_v18 = vpop.f32.mrb[7].mxu0  ;;  %v771_v60 = vld [vmem:[#allocation5 + $0xe8] sm:$0xff]  ;;  %v2809_v9 = vpack.c.bf16 %v775_v8, %v774_v6  ;;  %v777_v11 = vld [vmem:[#allocation5 + $0x118] sm:$0xff] }
 0x200   :  { %v592_v19 = vmax.f32 %v588_v10, 0.0  ;;  %v2958_v22 = vadd.f32 %v570_v18, %v368_v61  ;;  %v2801_v61 = vpack.c.bf16 %v771_v60, %v770_v59  ;;  %v776_v10 = vld [vmem:[#allocation5 + $0x110] sm:$0xff]  ;;  %v779_v18 = vld [vmem:[#allocation5 + $0x128] sm:$0xff] }
 0x201   :  { %v3268_v23 = vadd.f32 %v2957_v17, %v2050_v63  ;;  %v778_v17 = vld [vmem:[#allocation5 + $0x120] sm:$0xff] }
 0x202   :  { %v2745_v24 = vpack.c.bf16 %v593_v12, %v592_v19  ;;  %v3272_v25 = vadd.f32 %v2958_v22, %v2050_v63  ;;  %v773_v63 = vld [vmem:[#allocation5 + $0xf8] sm:$0xff]  ;;  %v780_v22 = vld [vmem:[#allocation5 + $0x130] sm:$0xff] }
 0x203   :  { %v595_v26 = vmax.f32 %v3268_v23, 0.0  ;;  %v2805_v3 = vpack.c.bf16 %v773_v63, %v772_v62  ;;  %v781_v23 = vld [vmem:[#allocation5 + $0x138] sm:$0xff] }
 0x204   :  { %v594_v27 = vmax.f32 %v3272_v25, 0.0  ;;  %2746 = vmatprep.subr.bf16.mxu1 %v2745_v24  ;;  %v968_v25 = vld [vmem:[#allocation5 + $0x1c0] sm:$0xff] }
 0x205   :  { %2748 = vmatpush3.bf16.msra.mxu1 %v2745_v24 }
 0x206   :  { %v2749_v28 = vpack.c.bf16 %v595_v26, %v594_v27 }
 0x208   :  { %2750 = vmatprep.subr.bf16.mxu1 %v2749_v28 }
 0x209   :  { %2752 = vmatpush3.bf16.msra.mxu1 %v2749_v28 }
 0x20a   :  { %2754 = vmatprep.subr.bf16.mxu1 %v2745_v24 }
 0x20c   :  { %2398 = vmatmul.mubr.msk.f32.vlgmr.msra.gmra.mrb[8].mxu1 %vm68_vm0, %v3223_v13 }
 0x20d   :  { %2756 = vmatpush3.bf16.msra.mxu1 %v2745_v24  ;;  %2400 = vmatprep.mubr.msk.f32.mxu1 %vm68_vm0, %v3227_v15  ;;  %v2821_v24 = vpack.c.bf16 %v781_v23, %v780_v22 }
 0x20e   :  { %2758 = vmatprep.subr.bf16.mxu1 %v2749_v28 }
 0x210   :  { %2401 = vmatmul.mubr.msk.f32.gmra.mrb[10].mxu1 %vm68_vm0, %v3237_v20 }
 0x211   :  { %2760 = vmatpush3.bf16.msra.mxu1 %v2749_v28  ;;  %2411 = vmatprep.mubr.msk.f32.mxu1 %vm68_vm0, %v3219_v7  ;;  %v970_v28 = vld [vmem:[#allocation5 + $0x1d0] sm:$0xff] }
 0x212   :  { %2762 = vmatprep.subr.bf16.mxu1 %v2761_v31  ;;  %v2829_v32 = vpack.c.bf16 %v971_v29, %v970_v28 }
 0x214   :  { %2412 = vmatmul.mubr.msk.f32.vlgmr.msra.gmra.mrb[12].mxu1 %vm68_vm0, %v3225_v14 }
 0x215   :  { %2764 = vmatpush3.bf16.msra.mxu1 %v2761_v31  ;;  %2414 = vmatprep.mubr.msk.f32.mxu1 %vm68_vm0, %v3229_v16 }
 0x216   :  { %2766 = vmatprep.subr.bf16.mxu1 %v2765_v34 }
 0x218   :  { %2415 = vmatmul.mubr.msk.f32.gmra.mrb[14].mxu1 %vm68_vm0, %v3241_v21 }
 0x219   :  { %2768 = vmatpush3.bf16.msra.mxu1 %v2765_v34  ;;  %2449 = vmatprep.mubr.f32.mxu1 %v592_v19  ;;  %v2817_v19 = vpack.c.bf16 %v779_v18, %v778_v17  ;;  %v973_v34 = vld [vmem:[#allocation5 + $0x1e8] sm:$0xff] }
 0x21a   :  { %2770 = vmatprep.subr.bf16.mxu1 %v2769_v37  ;;  %v2833_v36 = vpack.c.bf16 %v973_v34, %v972_v33 }
 0x21d   :  { %2772 = vmatpush3.bf16.msra.mxu1 %v2769_v37 }
 0x21e   :  { %2774 = vmatprep.subr.bf16.mxu1 %v2773_v40 }
 0x221   :  { %2776 = vmatpush3.bf16.msra.mxu1 %v2773_v40 }
 0x222   :  { %2778 = vmatprep.subr.bf16.mxu1 %v2777_v43 }
 0x225   :  { %2780 = vmatpush3.bf16.msra.mxu1 %v2777_v43  ;;  %v976_v43 = vld [vmem:[#allocation5 + $0x200] sm:$0xff] }
 0x226   :  { %2782 = vmatprep.subr.bf16.mxu1 %v2781_v46 }
 0x229   :  { %2784 = vmatpush3.bf16.msra.mxu1 %v2781_v46  ;;  %v2841_v46 = vpack.c.bf16 %v977_v44, %v976_v43 }
 0x22a   :  { %2786 = vmatprep.subr.bf16.mxu1 %v2785_v49 }
 0x22d   :  { %2788 = vmatpush3.bf16.msra.mxu1 %v2785_v49  ;;  %v979_v49 = vld [vmem:[#allocation5 + $0x218] sm:$0xff] }
 0x22e   :  { %2790 = vmatprep.subr.bf16.mxu1 %v2789_v52  ;;  %v2845_v50 = vpack.c.bf16 %v979_v49, %v978_v48 }
 0x231   :  { %2792 = vmatpush3.bf16.msra.mxu1 %v2789_v52  ;;  %v981_v52 = vld [vmem:[#allocation5 + $0x228] sm:$0xff] }
 0x232   :  { %2794 = vmatprep.subr.bf16.mxu1 %v2793_v55  ;;  %v2849_v53 = vpack.c.bf16 %v981_v52, %v980_v51 }
 0x234   :  { %2450 = vmatmul.mubr.f32.vlgmr.msra.gmra.mrb[16].mxu1 %v593_v12  ;;  %v2813_v12 = vpack.c.bf16 %v777_v11, %v776_v10 }
 0x235   :  { %2452 = vmatprep.mubr.f32.mxu1 %v594_v27  ;;  %2796 = vmatpush3.bf16.msra.mxu1 %v2793_v55  ;;  %v983_v55 = vld [vmem:[#allocation5 + $0x238] sm:$0xff] }
 0x236   :  { %2798 = vmatprep.subr.bf16.mxu1 %v2797_v58  ;;  %v2853_v56 = vpack.c.bf16 %v983_v55, %v982_v54 }
 0x238   :  { %2453 = vmatmul.mubr.f32.gmra.mrb[18].mxu1 %v595_v26  ;;  %v969_v26 = vld [vmem:[#allocation5 + $0x1c8] sm:$0xff] }
 0x239   :  { %2800 = vmatpush3.bf16.msra.mxu1 %v2797_v58  ;;  %v2825_v27 = vpack.c.bf16 %v969_v26, %v968_v25 }
 0x23a   :  { %2802 = vmatprep.subr.bf16.mxu1 %v2801_v61 }
 0x23d   :  { %2804 = vmatpush3.bf16.msra.mxu1 %v2801_v61 }
 0x23e   :  { %2806 = vmatprep.subr.bf16.mxu1 %v2805_v3 }
 0x241   :  { %2808 = vmatpush3.bf16.msra.mxu1 %v2805_v3 }
 0x242   :  { %2810 = vmatprep.subr.bf16.mxu1 %v2809_v9 }
 0x245   :  { %2812 = vmatpush3.bf16.msra.mxu1 %v2809_v9 }
 0x246   :  { %2814 = vmatprep.subr.bf16.mxu1 %v2813_v12 }
 0x249   :  { %2816 = vmatpush3.bf16.msra.mxu1 %v2813_v12 }
 0x24a   :  { %2818 = vmatprep.subr.bf16.mxu1 %v2817_v19 }
 0x24d   :  { %2820 = vmatpush3.bf16.msra.mxu1 %v2817_v19 }
 0x24e   :  { %2822 = vmatprep.subr.bf16.mxu1 %v2821_v24 }
 0x251   :  { %2824 = vmatpush3.bf16.msra.mxu1 %v2821_v24 }
 0x252   :  { %2826 = vmatprep.subr.bf16.mxu1 %v2825_v27 }
 0x2df   :  { %v2399_v30 = vpop.f32.mrb[8].mxu1 }
 0x2e0   :  { %v662_v31 = vpop.f32.mrb[9].mxu1 }
 0x2e1   :  { %2487 = vmatprep.mubr.f32.mxu1 %v662_v31 }
 0x2e2   :  { %2488 = vmatmul.mubr.f32.vlgmr.msra.gmra.mrb[16].mxu1 %v2399_v30 }
 0x2e3   :  { %2828 = vmatpush3.bf16.msra.mxu1 %v2825_v27  ;;  %v2402_v35 = vpop.f32.mrb[10].mxu1 }
 0x2e4   :  { %2830 = vmatprep.subr.bf16.mxu1 %v2829_v32  ;;  %v672_v37 = vpop.f32.mrb[11].mxu1 }
 0x2e5   :  { %2490 = vmatprep.mubr.f32.mxu1 %v672_v37 }
 0x2e6   :  { %2491 = vmatmul.mubr.f32.gmra.mrb[18].mxu1 %v2402_v35 }
 0x2e7   :  { %2832 = vmatpush3.bf16.msra.mxu1 %v2829_v32  ;;  %v2413_v40 = vpop.f32.mrb[12].mxu1 }
 0x2e8   :  { %2834 = vmatprep.subr.bf16.mxu1 %v2833_v36  ;;  %v747_v42 = vpop.f32.mrb[13].mxu1 }
 0x2e9   :  { %2525 = vmatprep.mubr.f32.mxu1 %v747_v42 }
 0x2eb   :  { %2836 = vmatpush3.bf16.msra.mxu1 %v2833_v36  ;;  %v2416_v45 = vpop.f32.mrb[14].mxu1 }
 0x2ec   :  { %2838 = vmatprep.subr.bf16.mxu1 %v2837_v41  ;;  %v757_v47 = vpop.f32.mrb[15].mxu1 }
 0x2ef   :  { %2840 = vmatpush3.bf16.msra.mxu1 %v2837_v41 }
 0x2f0   :  { %2842 = vmatprep.subr.bf16.mxu1 %v2841_v46 }
 0x2f3   :  { %2844 = vmatpush3.bf16.msra.mxu1 %v2841_v46 }
 0x2f4   :  { %2846 = vmatprep.subr.bf16.mxu1 %v2845_v50 }
 0x2f7   :  { %2848 = vmatpush3.bf16.msra.mxu1 %v2845_v50 }
 0x2f8   :  { %2850 = vmatprep.subr.bf16.mxu1 %v2849_v53 }
 0x2fb   :  { %2852 = vmatpush3.bf16.msra.mxu1 %v2849_v53 }
 0x2fc   :  { %2854 = vmatprep.subr.bf16.mxu1 %v2853_v56 }
 0x2ff   :  { %2856 = vmatpush3.bf16.msra.mxu1 %v2853_v56 }
 0x302   :  { %2526 = vmatmul.mubr.f32.vlgmr.msra.gmra.mrb[16].mxu1 %v2413_v40 }
 0x303   :  { %2528 = vmatprep.mubr.f32.mxu1 %v757_v47 }
 0x306   :  { %2529 = vmatmul.mubr.f32.gmra.mrb[18].mxu1 %v2416_v45 }
 0x3d5   :  { %v2527_v58 = vpop.f32.mrb[16].mxu1 }
 0x3d6   :  { %v3300_v59 = vadd.f32 %v2527_v58, %v2059_v57  ;;  %v1050_v60 = vpop.f32.mrb[17].mxu1 }
 0x3d7   :  { %v3306_v62 = vadd.f32 %v2059_v57, %v1050_v60 }
 0x3d8   :  { %1104 = vrot.lane.b32.xlu1 %v3300_v59, %s3123_s2  ;;  %1088 = vrot.lane.b32.xlu0 %v3300_v59, %s3124_s21 }
 0x3d9   :  { %v2530_v61 = vpop.f32.mrb[18].mxu1 }
 0x3da   :  { %v1060_v63 = vpop.f32.mrb[19].mxu1  ;;  %v3312_v3 = vadd.f32 %v2530_v61, %v2059_v57  ;;  %v1242_v61 = vld [vmem:[#allocation7] sm:$0xff] }
 0x3db   :  { %v3314_v6 = vadd.f32 %v2059_v57, %v1060_v63  ;;  %v1243_v63 = vld [vmem:[#allocation7 + $0x8] sm:$0xff] }
 0x3dc   :  { %1102 = vrot.lane.b32.xlu1 %v3306_v62, %s3123_s2  ;;  %1086 = vrot.lane.b32.xlu0 %v3306_v62, %s3124_s21 }
 0x3e0   :  { %1092 = vrot.lane.b32.xlu1 %v3312_v3, %s3124_s21  ;;  %1090 = vrot.lane.b32.xlu0 %v3314_v6, %s3124_s21 }
 0x3e4   :  { %1108 = vrot.lane.b32.xlu1 %v3312_v3, %s3123_s2  ;;  %1106 = vrot.lane.b32.xlu0 %v3314_v6, %s3123_s2 }
 0x44a   :  { %v1105_v8 = vpop.permute.xlu1 %1104  ;;  %v1089_v9 = vpop.permute.xlu0 %1088 }
 0x44b   :  { %v1099_v10 = vmax.f32 %v3300_v59, %v1089_v9 }
 0x44d   :  { %v3325_v11 = vmax.f32 %v1099_v10, %v1105_v8  ;;  %v2857_v8 = vpack.c.bf16 %v1243_v63, %v1242_v61 }
 0x44e   :  { %v1103_v12 = vpop.permute.xlu1 %1102  ;;  %v1087_v17 = vpop.permute.xlu0 %1086 }
 0x44f   :  { %v1098_v18 = vmax.f32 %v3306_v62, %v1087_v17  ;;  %1136 = vrot.lane.b32.xlu1 %v3325_v11, %s3125_s22  ;;  %2858 = vmatprep.subr.bf16.mxu0 %v2857_v8 }
 0x450   :  { %2860 = vmatpush3.bf16.msra.mxu0 %v2857_v8 }
 0x451   :  { %v3329_v19 = vmax.f32 %v1098_v18, %v1103_v12  ;;  %v1119_v12 = vsub.f32 %v3300_v59, %v3325_v11 }
 0x452   :  { %v1093_v22 = vpop.permute.xlu1 %1092  ;;  %v1091_v23 = vpop.permute.xlu0 %1090 }
 0x453   :  { %1180 = vrot.lane.b32.xlu1 %v3325_v11, %s3126_s23  ;;  %1134 = vrot.lane.b32.xlu0 %v3329_v19, %s3125_s22  ;;  %v1101_v24 = vmax.f32 %v3312_v3, %v1093_v22  ;;  %v1100_v27 = vmax.f32 %v3314_v6, %v1091_v23  ;;  %v1124_v17 = vmul.f32 1.442695, %v1119_v12  ;;  %v1118_v18 = vsub.f32 %v3306_v62, %v3329_v19 }
 0x455   :  { %v1122_v22 = vmul.f32 1.442695, %v1118_v18 }
 0x456   :  { %v1109_v25 = vpop.permute.xlu1 %1108  ;;  %v1107_v26 = vpop.permute.xlu0 %1106 }
 0x457   :  { %v3335_v28 = vmax.f32 %v1101_v24, %v1109_v25  ;;  %1178 = vrot.lane.b32.xlu0 %v3329_v19, %s3126_s23  ;;  %v3338_v29 = vmax.f32 %v1100_v27, %v1107_v26 }
 0x459   :  { %1140 = vrot.lane.b32.xlu1 %v3335_v28, %s3125_s22  ;;  %v1121_v23 = vsub.f32 %v3312_v3, %v3335_v28  ;;  %v1120_v24 = vsub.f32 %v3314_v6, %v3338_v29 }
 0x45b   :  { %1138 = vrot.lane.b32.xlu0 %v3338_v29, %s3125_s22  ;;  %v1128_v25 = vmul.f32 1.442695, %v1121_v23  ;;  %v1126_v27 = vmul.f32 1.442695, %v1120_v24 }
 0x45d   :  { %1184 = vrot.lane.b32.xlu1 %v3335_v28, %s3126_s23 }
 0x45f   :  { %1182 = vrot.lane.b32.xlu0 %v3338_v29, %s3126_s23 }
 0x4c1   :  { %v1137_v30 = vpop.permute.xlu1 %1136 }
 0x4c2   :  { %v1147_v31 = vsub.f32 %v3300_v59, %v1137_v30 }
 0x4c4   :  { %v1152_v32 = vmul.f32 1.442695, %v1147_v31 }
 0x4c5   :  { %v1181_v33 = vpop.permute.xlu1 %1180  ;;  %v1135_v34 = vpop.permute.xlu0 %1134 }
 0x4c6   :  { %2992 = vpow2.f32 %v1152_v32  ;;  %v1191_v35 = vsub.f32 %v3300_v59, %v1181_v33  ;;  %v1146_v36 = vsub.f32 %v3306_v62, %v1135_v34 }
 0x4c8   :  { %v1196_v37 = vmul.f32 1.442695, %v1191_v35  ;;  %v1150_v38 = vmul.f32 1.442695, %v1146_v36 }
 0x4c9   :  { %v1179_v39 = vpop.permute.xlu0 %1178 }
 0x4ca   :  { %2994 = vpow2.f32 %v1196_v37  ;;  %v1190_v40 = vsub.f32 %v3306_v62, %v1179_v39 }
 0x4cb   :  { %2996 = vpow2.f32 %v1150_v38  ;;  %v1141_v41 = vpop.permute.xlu1 %1140 }
 0x4cc   :  { %v1194_v42 = vmul.f32 1.442695, %v1190_v40  ;;  %v1149_v43 = vsub.f32 %v3312_v3, %v1141_v41 }
 0x4cd   :  { %v1139_v44 = vpop.permute.xlu0 %1138 }
 0x4ce   :  { %2998 = vpow2.f32 %v1194_v42  ;;  %v1156_v45 = vmul.f32 1.442695, %v1149_v43  ;;  %v1148_v46 = vsub.f32 %v3314_v6, %v1139_v44 }
 0x4cf   :  { %v1185_v47 = vpop.permute.xlu1 %1184 }
 0x4d0   :  { %v2993_v48 = vpop.eup %2992  ;;  %3000 = vpow2.f32 %v1156_v45  ;;  %v1154_v49 = vmul.f32 1.442695, %v1148_v46  ;;  %v1193_v50 = vsub.f32 %v3312_v3, %v1185_v47 }
 0x4d1   :  { %1164 = vrot.lane.b32.xlu1 %v2993_v48, %s3124_s21  ;;  %v1183_v51 = vpop.permute.xlu0 %1182 }
 0x4d2   :  { %3002 = vpow2.f32 %v1154_v49  ;;  %v1200_v52 = vmul.f32 1.442695, %v1193_v50  ;;  %v1192_v53 = vsub.f32 %v3314_v6, %v1183_v51 }
 0x4d4   :  { %v2995_v54 = vpop.eup %2994  ;;  %3004 = vpow2.f32 %v1200_v52  ;;  %v1198_v55 = vmul.f32 1.442695, %v1192_v53 }
 0x4d5   :  { %v2997_v56 = vpop.eup %2996  ;;  %1208 = vrot.lane.b32.xlu1 %v2995_v54, %s3123_s2 }
 0x4d6   :  { %3006 = vpow2.f32 %v1198_v55  ;;  %1162 = vrot.lane.b32.xlu0 %v2997_v56, %s3124_s21 }
 0x4d7   :  { %3008 = vpow2.f32 %v1124_v17 }
 0x4d8   :  { %v2999_v57 = vpop.eup %2998  ;;  %3010 = vpow2.f32 %v1122_v22 }
 0x4d9   :  { %3012 = vpow2.f32 %v1128_v25  ;;  %v1525_v25 = vld [vmem:[#allocation5 + $0x288] sm:$0xff] }
 0x4da   :  { %v3001_v58 = vpop.eup %3000  ;;  %1206 = vrot.lane.b32.xlu0 %v2999_v57, %s3123_s2  ;;  %3014 = vpow2.f32 %v1126_v27  ;;  %v1529_v27 = vld [vmem:[#allocation5 + $0x2a8] sm:$0xff] }
 0x4db   :  { %1168 = vrot.lane.b32.xlu1 %v3001_v58, %s3124_s21 }
 0x4dc   :  { %v3003_v60 = vpop.eup %3002 }
 0x4de   :  { %v3005_v9 = vpop.eup %3004  ;;  %1166 = vrot.lane.b32.xlu0 %v3003_v60, %s3124_s21 }
 0x4df   :  { %1212 = vrot.lane.b32.xlu1 %v3005_v9, %s3123_s2 }
 0x4e0   :  { %v3007_v10 = vpop.eup %3006 }
 0x4e1   :  { %v3009_v30 = vpop.eup %3008 }
 0x4e2   :  { %1210 = vrot.lane.b32.xlu0 %v3007_v10, %s3123_s2  ;;  %v3011_v62 = vpop.eup %3010 }
 0x4e3   :  { %v3013_v28 = vpop.eup %3012 }
 0x4e4   :  { %v3015_v36 = vpop.eup %3014 }
 0x543   :  { %v1165_v26 = vpop.permute.xlu1 %1164 }
 0x544   :  { %v1175_v31 = vadd.f32 %v3009_v30, %v1165_v26  ;;  %v1528_v26 = vld [vmem:[#allocation5 + $0x2a0] sm:$0xff]  ;;  %v1531_v30 = vld [vmem:[#allocation5 + $0x2b8] sm:$0xff] }
 0x547   :  { %v1209_v59 = vpop.permute.xlu1 %1208 }
 0x548   :  { %v1219_v11 = vadd.f32 %v1209_v59, %v1175_v31  ;;  %v1163_v32 = vpop.permute.xlu0 %1162  ;;  %v1517_v31 = vld [vmem:[#allocation5 + $0x248] sm:$0xff]  ;;  %v1518_v59 = vld [vmem:[#allocation5 + $0x250] sm:$0xff] }
 0x549   :  { %v1174_v19 = vadd.f32 %v3011_v62, %v1163_v32  ;;  %v1520_v32 = vld [vmem:[#allocation5 + $0x260] sm:$0xff]  ;;  %v1521_v62 = vld [vmem:[#allocation5 + $0x268] sm:$0xff] }
 0x54a   :  { %3016 = vrcp.f32 %v1219_v11 }
 0x54c   :  { %v1207_v33 = vpop.permute.xlu0 %1206 }
 0x54d   :  { %v1218_v34 = vadd.f32 %v1207_v33, %v1174_v19  ;;  %v1169_v3 = vpop.permute.xlu1 %1168  ;;  %v1522_v19 = vld [vmem:[#allocation5 + $0x270] sm:$0xff]  ;;  %v1523_v33 = vld [vmem:[#allocation5 + $0x278] sm:$0xff] }
 0x54e   :  { %v1177_v35 = vadd.f32 %v3013_v28, %v1169_v3  ;;  %v1726_v3 = vld [vmem:[#allocation5 + $0x2c0] sm:$0xff]  ;;  %v1727_v28 = vld [vmem:[#allocation5 + $0x2c8] sm:$0xff] }
 0x54f   :  { %3018 = vrcp.f32 %v1218_v34 }
 0x550   :  { %v1167_v6 = vpop.permute.xlu0 %1166 }
 0x551   :  { %v1213_v29 = vpop.permute.xlu1 %1212  ;;  %v1176_v38 = vadd.f32 %v3015_v36, %v1167_v6  ;;  %v1728_v6 = vld [vmem:[#allocation5 + $0x2d0] sm:$0xff] }
 0x552   :  { %v1221_v37 = vadd.f32 %v1213_v29, %v1177_v35  ;;  %v2909_v35 = vpack.c.bf16 %v1727_v28, %v1726_v3  ;;  %v1729_v29 = vld [vmem:[#allocation5 + $0x2d8] sm:$0xff]  ;;  %v2086_v3 = vld [vmem:[#allocation7 + $0x70] ss:$0 sm:$0xff] }
 0x554   :  { %v3017_v39 = vpop.eup %3016  ;;  %3020 = vrcp.f32 %v1221_v37  ;;  %v1211_v40 = vpop.permute.xlu0 %1210 }
 0x555   :  { %v1227_v41 = vmul.f32 %v3017_v39, %v1219_v11  ;;  %v1220_v42 = vadd.f32 %v1211_v40, %v1176_v38  ;;  %v1519_v11 = vld [vmem:[#allocation5 + $0x258] sm:$0xff]  ;;  %v2913_v38 = vpack.c.bf16 %v1729_v29, %v1728_v6  ;;  %v1731_v40 = vld [vmem:[#allocation5 + $0x2e8] sm:$0xff] }
 0x557   :  { %3022 = vrcp.f32 %v1220_v42  ;;  %v1231_v44 = vsub.f32 2.0, %v1227_v41 }
 0x559   :  { %v3019_v43 = vpop.eup %3018  ;;  %v1235_v47 = vmul.f32 %v3017_v39, %v1231_v44  ;;  %v1730_v39 = vld [vmem:[#allocation5 + $0x2e0] sm:$0xff]  ;;  %v1732_v44 = vld [vmem:[#allocation5 + $0x2f0] sm:$0xff] }
 0x55a   :  { %v1226_v45 = vmul.f32 %v3019_v43, %v1218_v34  ;;  %v2905_v34 = vpack.c.bf16 %v1523_v33, %v1522_v19  ;;  %v1848_v19 = vld [vmem:[#allocation7 + $0x50] sm:$0x3] }
 0x55b   :  { %v1239_v53 = vadd.f32 1.0, %v1235_v47 }
 0x55c   :  { %v1230_v46 = vsub.f32 2.0, %v1226_v45  ;;  %v1733_v45 = vld [vmem:[#allocation5 + $0x2f8] sm:$0xff] }
 0x55d   :  { %v2921_v47 = vpack.c.bf16 %v1733_v45, %v1732_v44 }
 0x55e   :  { %v3021_v48 = vpop.eup %3020  ;;  %v1234_v49 = vmul.f32 %v3019_v43, %v1230_v46  ;;  %v2917_v43 = vpack.c.bf16 %v1731_v40, %v1730_v39 }
 0x55f   :  { %v1229_v50 = vmul.f32 %v3021_v48, %v1221_v37 }
 0x560   :  { %v1238_v51 = vadd.f32 1.0, %v1234_v49 }
 0x561   :  { %v3023_v52 = vpop.eup %3022  ;;  %v1233_v54 = vsub.f32 2.0, %v1229_v50 }
 0x562   :  { %v1228_v55 = vmul.f32 %v3023_v52, %v1220_v42  ;;  %2535 = vmatprep.mubr.msk.f32.mxu0 %vm1244_vm2, %v1238_v51  ;;  %v3127_v51 = vmov 0.0|0.0  }
 0x563   :  { %2536 = vmatmul.mubr.msk.f32.vlgmr.msra.gmra.mrb[8].mxu0 %vm1244_vm2, %v1239_v53  ;;  %v1237_v57 = vmul.f32 %v3021_v48, %v1233_v54  ;;  %2925 = vmatprep.subr.bf16.mxu1 %v3127_v51  ;;  %v1922_v53 = vld [vmem:[#allocation5 + $0x300] sm:$0xff]  ;;  %v1923_v54 = vld [vmem:[#allocation5 + $0x308] sm:$0xff] }
 0x564   :  { %v1232_v56 = vsub.f32 2.0, %v1228_v55  ;;  %v1924_v55 = vld [vmem:[#allocation5 + $0x310] sm:$0xff] }
 0x565   :  { %v1241_v61 = vadd.f32 1.0, %v1237_v57  ;;  %v1925_v57 = vld [vmem:[#allocation5 + $0x318] sm:$0xff] }
 0x566   :  { %v1236_v58 = vmul.f32 %v3023_v52, %v1232_v56  ;;  %v3129_v52 = vmov 0.0   ;;  %v2932_v56 = vpack.c.bf16 %v1923_v54, %v1922_v53 }
 0x567   :  { %2643 = vmatprep.mubr.msk.f32.mxu1 %vm3128_vm3, %v3129_v52 }
 0x568   :  { %v1240_v60 = vadd.f32 1.0, %v1236_v58  ;;  %v2935_v58 = vpack.c.bf16 %v1925_v57, %v1924_v55 }
 0x56a   :  { %2538 = vmatprep.mubr.msk.f32.mxu0 %vm1244_vm2, %v1240_v60  ;;  %v1926_v60 = vld [vmem:[#allocation5 + $0x320] sm:$0xff] }
 0x56b   :  { %2539 = vmatmul.mubr.msk.f32.gmra.mrb[10].mxu0 %vm1244_vm2, %v1241_v61  ;;  %v1927_v61 = vld [vmem:[#allocation5 + $0x328] sm:$0xff] }
 0x56c   :  { %2549 = vmatprep.mubr.msk.f32.mxu0 %vm68_vm0, %v3213_v5  ;;  %v1524_v5 = vld [vmem:[#allocation5 + $0x280] sm:$0xff] }
 0x636   :  { %v2537_v63 = vpop.f32.mrb[8].mxu0 }
 0x637   :  { %v1343_v8 = vmul.f32 %v2537_v63, %v3205_v1  ;;  %v1323_v9 = vpop.f32.mrb[9].mxu0  ;;  %v1526_v1 = vld [vmem:[#allocation5 + $0x290] sm:$0xff]  ;;  %v2938_v63 = vpack.c.bf16 %v1927_v61, %v1926_v60 }
 0x638   :  { %v1342_v10 = vmul.f32 %v1323_v9, %v3203_v0  ;;  %v2877_v0 = vpack.c.bf16 %v1525_v25, %v1524_v5  ;;  %v1929_v9 = vld [vmem:[#allocation5 + $0x338] sm:$0xff]  ;;  %v1934_v5 = vld [vmem:[#allocation5 + $0x360] sm:$0xff]  ;;  %v1935_v25 = vld [vmem:[#allocation5 + $0x368] sm:$0xff] }
 0x63a   :  { %v2861_v12 = vpack.c.bf16 %v1343_v8, %v1342_v10 }
 0x63c   :  { %2862 = vmatprep.subr.bf16.mxu0 %v2861_v12 }
 0x63d   :  { %2864 = vmatpush3.bf16.msra.mxu0 %v2861_v12 }
 0x63e   :  { %v2540_v17 = vpop.f32.mrb[10].mxu0 }
 0x63f   :  { %v1345_v18 = vmul.f32 %v2540_v17, %v3211_v4  ;;  %v1333_v22 = vpop.f32.mrb[11].mxu0  ;;  %v1527_v4 = vld [vmem:[#allocation5 + $0x298] sm:$0xff]  ;;  %v1931_v17 = vld [vmem:[#allocation5 + $0x348] sm:$0xff] }
 0x640   :  { %v1344_v23 = vmul.f32 %v1333_v22, %v3207_v2  ;;  %v2881_v2 = vpack.c.bf16 %v1527_v4, %v1526_v1  ;;  %v1932_v22 = vld [vmem:[#allocation5 + $0x350] sm:$0xff]  ;;  %v1937_v4 = vld [vmem:[#allocation5 + $0x378] sm:$0xff] }
 0x641   :  { %v1936_v1 = vld [vmem:[#allocation5 + $0x370] sm:$0xff] }
 0x642   :  { %v2865_v24 = vpack.c.bf16 %v1345_v18, %v1344_v23 }
 0x644   :  { %2866 = vmatprep.subr.bf16.mxu0 %v2865_v24 }
 0x645   :  { %2868 = vmatpush3.bf16.msra.mxu0 %v2865_v24 }
 0x646   :  { %2870 = vmatprep.subr.bf16.mxu0 %v2861_v12 }
 0x648   :  { %2550 = vmatmul.mubr.msk.f32.vlgmr.msra.gmra.mrb[12].mxu0 %vm68_vm0, %v3223_v13  ;;  %v2885_v13 = vpack.c.bf16 %v1529_v27, %v1528_v26  ;;  %v2084_v26 = vld [vmem:[#allocation7 + $0x68] ss:$0 sm:$0xff] }
 0x649   :  { %2872 = vmatpush3.bf16.msra.mxu0 %v2861_v12  ;;  %2552 = vmatprep.mubr.msk.f32.mxu0 %vm68_vm0, %v3227_v15  ;;  %v1530_v15 = vld [vmem:[#allocation5 + $0x2b0] sm:$0xff]  ;;  %v1930_v12 = vld [vmem:[#allocation5 + $0x340] sm:$0xff] }
 0x64a   :  { %2874 = vmatprep.subr.bf16.mxu0 %v2865_v24 }
 0x64c   :  { %2553 = vmatmul.mubr.msk.f32.gmra.mrb[14].mxu0 %vm68_vm0, %v3237_v20  ;;  %v1516_v20 = vld [vmem:[#allocation5 + $0x240] sm:$0xff] }
 0x64d   :  { %2876 = vmatpush3.bf16.msra.mxu0 %v2865_v24  ;;  %2563 = vmatprep.mubr.msk.f32.mxu0 %vm68_vm0, %v3219_v7  ;;  %v2889_v7 = vpack.c.bf16 %v1531_v30, %v1530_v15 }
 0x64e   :  { %2878 = vmatprep.subr.bf16.mxu0 %v2877_v0 }
 0x650   :  { %2564 = vmatmul.mubr.msk.f32.vlgmr.msra.gmra.mrb[16].mxu0 %vm68_vm0, %v3225_v14  ;;  %v2893_v14 = vpack.c.bf16 %v1517_v31, %v1516_v20 }
 0x651   :  { %2880 = vmatpush3.bf16.msra.mxu0 %v2877_v0  ;;  %2566 = vmatprep.mubr.msk.f32.mxu0 %vm68_vm0, %v3229_v16  ;;  %v2897_v16 = vpack.c.bf16 %v1519_v11, %v1518_v59  ;;  %v2950_v0 = vpack.c.bf16 %v1935_v25, %v1934_v5 }
 0x652   :  { %2882 = vmatprep.subr.bf16.mxu0 %v2881_v2 }
 0x654   :  { %2567 = vmatmul.mubr.msk.f32.gmra.mrb[18].mxu0 %vm68_vm0, %v3241_v21  ;;  %v2901_v21 = vpack.c.bf16 %v1521_v62, %v1520_v32 }
 0x655   :  { %2884 = vmatpush3.bf16.msra.mxu0 %v2881_v2  ;;  %2585 = vmatprep.mubr.msk.f32.mxu0 %vm279_vm1, %v1342_v10  ;;  %v2953_v2 = vpack.c.bf16 %v1937_v4, %v1936_v1 }
 0x656   :  { %2886 = vmatprep.subr.bf16.mxu0 %v2885_v13 }
 0x659   :  { %2888 = vmatpush3.bf16.msra.mxu0 %v2885_v13 }
 0x65a   :  { %2890 = vmatprep.subr.bf16.mxu0 %v2889_v7 }
 0x65d   :  { %2892 = vmatpush3.bf16.msra.mxu0 %v2889_v7 }
 0x65e   :  { %2894 = vmatprep.subr.bf16.mxu0 %v2893_v14 }
 0x660   :  { %2586 = vmatmul.mubr.msk.f32.vlgmr.msra.gmra.mrb[20].mxu0 %vm279_vm1, %v1343_v8  ;;  %v1928_v8 = vld [vmem:[#allocation5 + $0x330] sm:$0xff] }
 0x661   :  { %2588 = vmatprep.mubr.msk.f32.mxu0 %vm279_vm1, %v1344_v23  ;;  %2896 = vmatpush3.bf16.msra.mxu0 %v2893_v14  ;;  %v2941_v10 = vpack.c.bf16 %v1929_v9, %v1928_v8  ;;  %v1933_v23 = vld [vmem:[#allocation5 + $0x358] sm:$0xff] }
 0x662   :  { %2898 = vmatprep.subr.bf16.mxu0 %v2897_v16  ;;  %v2947_v24 = vpack.c.bf16 %v1933_v23, %v1932_v22 }
 0x664   :  { %2589 = vmatmul.mubr.msk.f32.gmra.mrb[22].mxu0 %vm279_vm1, %v1345_v18  ;;  %v2944_v18 = vpack.c.bf16 %v1931_v17, %v1930_v12 }
 0x665   :  { %2900 = vmatpush3.bf16.msra.mxu0 %v2897_v16 }
 0x666   :  { %2902 = vmatprep.subr.bf16.mxu0 %v2901_v21 }
 0x669   :  { %2904 = vmatpush3.bf16.msra.mxu0 %v2901_v21 }
 0x66a   :  { %2906 = vmatprep.subr.bf16.mxu0 %v2905_v34 }
 0x66d   :  { %2908 = vmatpush3.bf16.msra.mxu0 %v2905_v34 }
 0x66e   :  { %2910 = vmatprep.subr.bf16.mxu0 %v2909_v35 }
 0x71b   :  { %v2551_v36 = vpop.f32.mrb[12].mxu0 }
 0x71c   :  { %v1412_v37 = vpop.f32.mrb[13].mxu0 }
 0x71d   :  { %2607 = vmatprep.mubr.msk.f32.mxu0 %vm279_vm1, %v1412_v37 }
 0x71e   :  { %2608 = vmatmul.mubr.msk.f32.vlgmr.msra.gmra.mrb[20].mxu0 %vm279_vm1, %v2551_v36 }
 0x71f   :  { %2912 = vmatpush3.bf16.msra.mxu0 %v2909_v35  ;;  %v2554_v41 = vpop.f32.mrb[14].mxu0 }
 0x720   :  { %2914 = vmatprep.subr.bf16.mxu0 %v2913_v38  ;;  %v1422_v42 = vpop.f32.mrb[15].mxu0 }
 0x721   :  { %2610 = vmatprep.mubr.msk.f32.mxu0 %vm279_vm1, %v1422_v42 }
 0x722   :  { %2611 = vmatmul.mubr.msk.f32.gmra.mrb[22].mxu0 %vm279_vm1, %v2554_v41 }
 0x723   :  { %2916 = vmatpush3.bf16.msra.mxu0 %v2913_v38  ;;  %v2565_v46 = vpop.f32.mrb[16].mxu0 }
 0x724   :  { %2918 = vmatprep.subr.bf16.mxu0 %v2917_v43  ;;  %v1497_v48 = vpop.f32.mrb[17].mxu0 }
 0x725   :  { %2629 = vmatprep.mubr.msk.f32.mxu0 %vm279_vm1, %v1497_v48 }
 0x727   :  { %2920 = vmatpush3.bf16.msra.mxu0 %v2917_v43  ;;  %v2568_v49 = vpop.f32.mrb[18].mxu0 }
 0x728   :  { %2922 = vmatprep.subr.bf16.mxu0 %v2921_v47  ;;  %v1507_v50 = vpop.f32.mrb[19].mxu0 }
 0x72b   :  { %2924 = vmatpush3.bf16.msra.mxu0 %v2921_v47 }
 0x72c   :  { %2931 = vmatprep.subr.bf16.mxu0 %v3127_v51 }
 0x72e   :  { %2630 = vmatmul.mubr.msk.f32.vlgmr.msra.gmra.mrb[20].mxu0 %vm279_vm1, %v2565_v46 }
 0x72f   :  { %2632 = vmatprep.mubr.msk.f32.mxu0 %vm279_vm1, %v1507_v50  ;;  %2933 = vmatpush3.bf16.msra.mxu0 %v2932_v56 }
 0x730   :  { %2934 = vmatprep.subr.bf16.mxu0 %v3127_v51 }
 0x732   :  { %2633 = vmatmul.mubr.msk.f32.gmra.mrb[22].mxu0 %vm279_vm1, %v2568_v49 }
 0x733   :  { %2678 = vmatprep.mubr.msk.f32.mxu0 %vm3128_vm3, %v3129_v52  ;;  %2936 = vmatpush3.bf16.msra.mxu0 %v2935_v58 }
 0x734   :  { %2937 = vmatprep.subr.bf16.mxu0 %v3127_v51 }
 0x737   :  { %2939 = vmatpush3.bf16.msra.mxu0 %v2938_v63 }
 0x738   :  { %2940 = vmatprep.subr.bf16.mxu0 %v3127_v51 }
 0x73b   :  { %2942 = vmatpush3.bf16.msra.mxu0 %v2941_v10 }
 0x73c   :  { %2943 = vmatprep.subr.bf16.mxu0 %v3127_v51 }
 0x73f   :  { %2945 = vmatpush3.bf16.msra.mxu0 %v2944_v18 }
 0x740   :  { %2946 = vmatprep.subr.bf16.mxu0 %v3127_v51 }
 0x743   :  { %2948 = vmatpush3.bf16.msra.mxu0 %v2947_v24 }
 0x744   :  { %2949 = vmatprep.subr.bf16.mxu0 %v3127_v51 }
 0x747   :  { %2951 = vmatpush3.bf16.msra.mxu0 %v2950_v0 }
 0x748   :  { %2952 = vmatprep.subr.bf16.mxu0 %v3127_v51 }
 0x74b   :  { %2954 = vmatpush3.bf16.msra.mxu0 %v2953_v2 }
 0x801   :  { %v2631_v27 = vpop.f32.mrb[20].mxu0 }
 0x802   :  { %v1841_v13 = vadd.f32 %v2631_v27, %v2084_v26  ;;  %v1812_v15 = vpop.f32.mrb[21].mxu0 }
 0x803   :  { %v1840_v30 = vadd.f32 %v2084_v26, %v1812_v15 }
 0x804   :  { %v1845_v7 = vmax.f32 %v1841_v13, 0.0 }
 0x805   :  { %v1844_v20 = vmax.f32 %v1840_v30, 0.0  ;;  %v2634_v31 = vpop.f32.mrb[22].mxu0 }
 0x806   :  { %v1843_v14 = vadd.f32 %v2634_v31, %v2084_v26  ;;  %v1822_v59 = vpop.f32.mrb[23].mxu0 }
 0x807   :  { %v2926_v11 = vpack.c.bf16 %v1845_v7, %v1844_v20  ;;  %v1842_v16 = vadd.f32 %v2084_v26, %v1822_v59 }
 0x808   :  { %v1847_v32 = vmax.f32 %v1843_v14, 0.0 }
 0x809   :  { %v1846_v62 = vmax.f32 %v1842_v16, 0.0  ;;  %2927 = vmatpush3.bf16.msra.mxu1 %v2926_v11 }
 0x80a   :  { %2928 = vmatprep.subr.bf16.mxu1 %v3127_v51 }
 0x80b   :  { %v2929_v21 = vpack.c.bf16 %v1847_v32, %v1846_v62 }
 0x80d   :  { %2930 = vmatpush3.bf16.msra.mxu1 %v2929_v21 }
 0x810   :  { %2644 = vmatmul.mubr.msk.f32.vlgmr.msra.gmra.mrb[20].mxu1 %vm68_vm0, %v1848_v19 }
 0x8e3   :  { %v1918_v33 = vpop.f32.mrb[20].mxu1 }
 0x8e4   :  { %v2645_v34 = vpop.f32.mrb[21].mxu1  ;;  %2679 = vmatmul.mubr.f32.vlgmr.msra.gmra.mrb[24].mxu0 %v1918_v33 }
 0x9b7   :  { %v2009_v28 = vpop.f32.mrb[24].mxu0 }
 0x9b8   :  { %v2010_v35 = vadd.f32 %v2086_v3, %v2009_v28  ;;  %v2680_v6 = vpop.f32.mrb[25].mxu0 }
 0x9ba   :  { %2013 = vst [vmem:[#allocation8] sm:$0x3] %v2010_v35 }
 0x9bb   :  { %3101 = shalt.err (!%p3098_p0)
}
 0x9bc   :  { %s3102_s29 = scalar_lea.hbm %s3416_s3, 32 }
 0x9bd   :  { %p3103_p1 = scmp.ne.s32.totalorder %s3416_s3, %s3102_s29  ;;  %p3106_p2 = scmp.lt.u32.totalorder %s3102_s29, %s3416_s3 }
 0x9bf   :  { %p3108_p3 = pnand %p3106_p2, %p3103_p1 }
 0x9c1   :  { %3111 = shalt.err (!%p3108_p3)
}
 0x9c2   :  { %2023 = dma.vmem_to_hbm [thread:$0]  %s2021_s25, 32, %s3416_s3, [#allocation4]  }
 0x9c3   :  { %3116 = dma.done.wait [#allocation4], 32  }
 0x9c4   :  { %3117 = vsyncadd [#allocation4], 4294967264 }
 0x9c5   :  { %2027 = vsyncpa [#allocation3], 1 }
 0x9c6   :  { %2028 = vsyncpa [#allocation6], 1 }
 0x9c7   :  { %2029 = vsyncpa [#allocation4], 1 }

</bundles_post_ra>
